<compile_context>
chip_gen: v5e
topology: v5e:2x2
jax: 0.10.0
libtpu: 0.0.40
codegen_flags: <defaults>
</compile_context>

<pallas_src>
import functools

import jax
import jax.numpy as jnp
from jax.experimental import pallas as pl
from jax.experimental.pallas import tpu as pltpu


def _round_up(n: int, m: int) -> int:
    return ((n + m - 1) // m) * m


def mlp_kernel(x_ref, w1_ref, b1_ref, w2_ref, b2_ref, w3_ref, b3_ref, o_ref):
    compute_dtype = x_ref.dtype
    # Layer 1: MXU dot (f32 accumulate), bias add + tanh in f32.
    h = jnp.dot(x_ref[...], w1_ref[...], preferred_element_type=jnp.float32)
    h = jnp.tanh(h + b1_ref[...]).astype(compute_dtype)
    # Layer 2.
    h = jnp.dot(h, w2_ref[...], preferred_element_type=jnp.float32)
    h = jnp.tanh(h + b2_ref[...]).astype(compute_dtype)
    # Layer 3 (no activation).
    y = jnp.dot(h, w3_ref[...], preferred_element_type=jnp.float32) + b3_ref[...]
    o_ref[...] = y.astype(o_ref.dtype)


@functools.partial(jax.jit, static_argnames=("block_b", "compute_dtype"))
def mlp_pallas(x, w1, b1, w2, b2, w3, b3, *, block_b=512,
               compute_dtype=jnp.float32):
    out_dtype = x.dtype
    B, d_in = x.shape
    h1 = w1.shape[1]
    h2 = w2.shape[1]
    d_out = w3.shape[1]

    LANE, SUBLANE = 128, 8

    # Lane-dense padding of all feature axes.
    d_in_p = _round_up(d_in, LANE)
    h1_p = _round_up(h1, LANE)
    h2_p = _round_up(h2, LANE)
    d_out_p = _round_up(d_out, LANE)

    # Batch tile: multiple of 8 sublanes, clamped to the padded batch.
    bb = min(_round_up(block_b, SUBLANE), _round_up(B, SUBLANE))
    B_p = _round_up(B, bb)
    grid = (B_p // bb,)

    def pad2(a, rows, cols):
        return jnp.pad(a, ((0, rows - a.shape[0]), (0, cols - a.shape[1])))

    x_p = pad2(x, B_p, d_in_p).astype(compute_dtype)
    w1_p = pad2(w1, d_in_p, h1_p).astype(compute_dtype)
    w2_p = pad2(w2, h1_p, h2_p).astype(compute_dtype)
    w3_p = pad2(w3, h2_p, d_out_p).astype(compute_dtype)
    # Biases stay f32 (accumulation / activation precision).
    b1_p = pad2(b1.reshape(1, -1), 1, h1_p).astype(jnp.float32)
    b2_p = pad2(b2.reshape(1, -1), 1, h2_p).astype(jnp.float32)
    b3_p = pad2(b3.reshape(1, -1), 1, d_out_p).astype(jnp.float32)

    itemsize = jnp.dtype(compute_dtype).itemsize
    flops = 2 * B_p * (d_in_p * h1_p + h1_p * h2_p + h2_p * d_out_p)
    transcendentals = B_p * (h1_p + h2_p)
    bytes_accessed = (
        (B_p * d_in_p + d_in_p * h1_p + h1_p * h2_p + h2_p * d_out_p) * itemsize
        + (h1_p + h2_p + d_out_p) * 4
        + B_p * d_out_p * jnp.dtype(out_dtype).itemsize
    )

    out = pl.pallas_call(
        mlp_kernel,
        out_shape=jax.ShapeDtypeStruct((B_p, d_out_p), out_dtype),
        grid_spec=pltpu.PrefetchScalarGridSpec(
            num_scalar_prefetch=0,
            grid=grid,
            in_specs=[
                pl.BlockSpec((bb, d_in_p), lambda i: (i, 0)),      # x tile
                pl.BlockSpec((d_in_p, h1_p), lambda i: (0, 0)),    # w1
                pl.BlockSpec((1, h1_p), lambda i: (0, 0)),         # b1
                pl.BlockSpec((h1_p, h2_p), lambda i: (0, 0)),      # w2
                pl.BlockSpec((1, h2_p), lambda i: (0, 0)),         # b2
                pl.BlockSpec((h2_p, d_out_p), lambda i: (0, 0)),   # w3
                pl.BlockSpec((1, d_out_p), lambda i: (0, 0)),      # b3
            ],
            out_specs=pl.BlockSpec((bb, d_out_p), lambda i: (i, 0)),
        ),
        compiler_params=pltpu.CompilerParams(
            dimension_semantics=("parallel",),
        ),
        cost_estimate=pl.CostEstimate(
            flops=flops,
            transcendentals=transcendentals,
            bytes_accessed=bytes_accessed,
        ),
    )(x_p, w1_p, b1_p, w2_p, b2_p, w3_p, b3_p)

    # Strip batch / lane padding.
    return out[:B, :d_out]


def mlp_reference(x, w1, b1, w2, b2, w3, b3):
    h = jnp.tanh(x @ w1 + b1)
    h = jnp.tanh(h @ w2 + b2)
    return h @ w3 + b3


if __name__ == "__main__":
    key = jax.random.PRNGKey(0)

    def init_linear(kw, kb, fan_in, fan_out):
        # PyTorch nn.Linear default: U(-1/sqrt(fan_in), 1/sqrt(fan_in)).
        bound = 1.0 / jnp.sqrt(jnp.float32(fan_in))
        w = jax.random.uniform(kw, (fan_in, fan_out), jnp.float32, -bound, bound)
        b = jax.random.uniform(kb, (1, fan_out), jnp.float32, -bound, bound)
        return w, b

    # --- Test 1: small shapes, f32 compute, exact-ish match vs reference ---
    B = 8
    input_dim = 16
    layers_widths = [32, 32, 2]
    keys = jax.random.split(key, 7)
    x = jax.random.normal(keys[0], (B, input_dim), dtype=jnp.float32)
    w1, b1 = init_linear(keys[1], keys[2], input_dim, layers_widths[0])
    w2, b2 = init_linear(keys[3], keys[4], layers_widths[0], layers_widths[1])
    w3, b3 = init_linear(keys[5], keys[6], layers_widths[1], layers_widths[2])

    out = mlp_pallas(x, w1, b1, w2, b2, w3, b3, block_b=512,
                     compute_dtype=jnp.float32)
    out = jax.block_until_ready(out)
    ref = mlp_reference(x, w1, b1, w2, b2, w3, b3)
    assert out.shape == (B, layers_widths[-1])
    assert jnp.allclose(out, ref, atol=1e-5, rtol=1e-5), "f32 mismatch vs reference"

    # --- Test 2: default module widths, multi-step grid (megacore-friendly),
    #             bf16 MXU path with f32 accumulation ---
    B2 = 256
    layers_widths2 = [100, 100, 2]
    keys2 = jax.random.split(jax.random.PRNGKey(1), 7)
    x2 = jax.random.normal(keys2[0], (B2, input_dim), dtype=jnp.float32)
    v1, c1 = init_linear(keys2[1], keys2[2], input_dim, layers_widths2[0])
    v2, c2 = init_linear(keys2[3], keys2[4], layers_widths2[0], layers_widths2[1])
    v3, c3 = init_linear(keys2[5], keys2[6], layers_widths2[1], layers_widths2[2])

    out2 = mlp_pallas(x2, v1, c1, v2, c2, v3, c3, block_b=128,
                      compute_dtype=jnp.bfloat16)
    out2 = jax.block_until_ready(out2)
    ref2 = mlp_reference(x2, v1, c1, v2, c2, v3, c3)
    assert out2.shape == (B2, layers_widths2[-1])
    assert jnp.allclose(out2, ref2, atol=5e-2, rtol=5e-2), "bf16 mismatch vs reference"

    print("KERNEL_OK")
</pallas_src>

<mosaic_0001>
module attributes {stable_mosaic.version = 11 : i64} {
  func.func @mlp_kernel(%arg0: i32, %arg1: memref<8x128xf32, #tpu.memory_space<vmem>>, %arg2: memref<128x128xf32, #tpu.memory_space<vmem>>, %arg3: memref<1x128xf32, #tpu.memory_space<vmem>>, %arg4: memref<128x128xf32, #tpu.memory_space<vmem>>, %arg5: memref<1x128xf32, #tpu.memory_space<vmem>>, %arg6: memref<128x128xf32, #tpu.memory_space<vmem>>, %arg7: memref<1x128xf32, #tpu.memory_space<vmem>>, %arg8: memref<8x128xf32, #tpu.memory_space<vmem>>) attributes {dimension_semantics = [#tpu.dimension_semantics<parallel>], iteration_bounds = array<i64: 1>, scalar_prefetch = 0 : i64, scratch_operands = 0 : i64, tpu.core_type = #tpu.core_type<tc>, window_params = [{transform_indices = @transform_0, window_bounds = array<i64: 8, 128>}, {pipeline_mode = #tpu.pipeline_mode<synchronous>, transform_indices = @transform_1, window_bounds = array<i64: 128, 128>}, {pipeline_mode = #tpu.pipeline_mode<synchronous>, transform_indices = @transform_2, window_bounds = array<i64: 1, 128>}, {pipeline_mode = #tpu.pipeline_mode<synchronous>, transform_indices = @transform_3, window_bounds = array<i64: 128, 128>}, {pipeline_mode = #tpu.pipeline_mode<synchronous>, transform_indices = @transform_4, window_bounds = array<i64: 1, 128>}, {pipeline_mode = #tpu.pipeline_mode<synchronous>, transform_indices = @transform_5, window_bounds = array<i64: 128, 128>}, {pipeline_mode = #tpu.pipeline_mode<synchronous>, transform_indices = @transform_6, window_bounds = array<i64: 1, 128>}, {transform_indices = @transform_7, window_bounds = array<i64: 8, 128>}]} {
    %c0 = arith.constant 0 : index
    %c0_0 = arith.constant 0 : index
    %0 = vector.load %arg1[%c0, %c0_0] : memref<8x128xf32, #tpu.memory_space<vmem>>, vector<8x128xf32>
    %c0_1 = arith.constant 0 : index
    %c0_2 = arith.constant 0 : index
    %1 = vector.load %arg2[%c0_1, %c0_2] : memref<128x128xf32, #tpu.memory_space<vmem>>, vector<128x128xf32>
    %cst = arith.constant dense<0.000000e+00> : vector<8x128xf32>
    %2 = tpu.matmul %0, %1, %cst {dimension_numbers = #tpu.dot_dimension_numbers<[1], [0], [0], [1], [0, 0, 1, 1], [], []>} : vector<8x128xf32>, vector<128x128xf32>, vector<8x128xf32> -> vector<8x128xf32>
    %c0_3 = arith.constant 0 : index
    %c0_4 = arith.constant 0 : index
    %3 = vector.load %arg3[%c0_3, %c0_4] : memref<1x128xf32, #tpu.memory_space<vmem>>, vector<1x128xf32>
    %4 = vector.broadcast %3 : vector<1x128xf32> to vector<8x128xf32>
    %5 = arith.addf %2, %4 : vector<8x128xf32>
    %6 = math.tanh %5 : vector<8x128xf32>
    %c0_5 = arith.constant 0 : index
    %c0_6 = arith.constant 0 : index
    %7 = vector.load %arg4[%c0_5, %c0_6] : memref<128x128xf32, #tpu.memory_space<vmem>>, vector<128x128xf32>
    %cst_7 = arith.constant dense<0.000000e+00> : vector<8x128xf32>
    %8 = tpu.matmul %6, %7, %cst_7 {dimension_numbers = #tpu.dot_dimension_numbers<[1], [0], [0], [1], [0, 0, 1, 1], [], []>} : vector<8x128xf32>, vector<128x128xf32>, vector<8x128xf32> -> vector<8x128xf32>
    %c0_8 = arith.constant 0 : index
    %c0_9 = arith.constant 0 : index
    %9 = vector.load %arg5[%c0_8, %c0_9] : memref<1x128xf32, #tpu.memory_space<vmem>>, vector<1x128xf32>
    %10 = vector.broadcast %9 : vector<1x128xf32> to vector<8x128xf32>
    %11 = arith.addf %8, %10 : vector<8x128xf32>
    %12 = math.tanh %11 : vector<8x128xf32>
    %c0_10 = arith.constant 0 : index
    %c0_11 = arith.constant 0 : index
    %13 = vector.load %arg6[%c0_10, %c0_11] : memref<128x128xf32, #tpu.memory_space<vmem>>, vector<128x128xf32>
    %cst_12 = arith.constant dense<0.000000e+00> : vector<8x128xf32>
    %14 = tpu.matmul %12, %13, %cst_12 {dimension_numbers = #tpu.dot_dimension_numbers<[1], [0], [0], [1], [0, 0, 1, 1], [], []>} : vector<8x128xf32>, vector<128x128xf32>, vector<8x128xf32> -> vector<8x128xf32>
    %c0_13 = arith.constant 0 : index
    %c0_14 = arith.constant 0 : index
    %15 = vector.load %arg7[%c0_13, %c0_14] : memref<1x128xf32, #tpu.memory_space<vmem>>, vector<1x128xf32>
    %16 = vector.broadcast %15 : vector<1x128xf32> to vector<8x128xf32>
    %17 = arith.addf %14, %16 : vector<8x128xf32>
    %c0_15 = arith.constant 0 : index
    %c0_16 = arith.constant 0 : index
    %18 = vector.load %arg8[%c0_15, %c0_16] : memref<8x128xf32, #tpu.memory_space<vmem>>, vector<8x128xf32>
    tpu.vector_store %arg8[%c0_15, %c0_16], %17 {strides = array<i32>} : memref<8x128xf32, #tpu.memory_space<vmem>>, vector<8x128xf32>,
    return
  }
  func.func @transform_0(%arg0: i32) -> (i32, i32) {
    %c0_i32 = arith.constant 0 : i32
    %c0_i32_0 = arith.constant 0 : i32
    return %arg0, %c0_i32 : i32, i32
  }
  func.func @transform_1(%arg0: i32) -> (i32, i32) {
    %c0_i32 = arith.constant 0 : i32
    %c0_i32_0 = arith.constant 0 : i32
    %c0_i32_1 = arith.constant 0 : i32
    return %c0_i32, %c0_i32_0 : i32, i32
  }
  func.func @transform_2(%arg0: i32) -> (i32, i32) {
    %c0_i32 = arith.constant 0 : i32
    %c0_i32_0 = arith.constant 0 : i32
    %c0_i32_1 = arith.constant 0 : i32
    return %c0_i32, %c0_i32_0 : i32, i32
  }
  func.func @transform_3(%arg0: i32) -> (i32, i32) {
    %c0_i32 = arith.constant 0 : i32
    %c0_i32_0 = arith.constant 0 : i32
    %c0_i32_1 = arith.constant 0 : i32
    return %c0_i32, %c0_i32_0 : i32, i32
  }
  func.func @transform_4(%arg0: i32) -> (i32, i32) {
    %c0_i32 = arith.constant 0 : i32
    %c0_i32_0 = arith.constant 0 : i32
    %c0_i32_1 = arith.constant 0 : i32
    return %c0_i32, %c0_i32_0 : i32, i32
  }
  func.func @transform_5(%arg0: i32) -> (i32, i32) {
    %c0_i32 = arith.constant 0 : i32
    %c0_i32_0 = arith.constant 0 : i32
    %c0_i32_1 = arith.constant 0 : i32
    return %c0_i32, %c0_i32_0 : i32, i32
  }
  func.func @transform_6(%arg0: i32) -> (i32, i32) {
    %c0_i32 = arith.constant 0 : i32
    %c0_i32_0 = arith.constant 0 : i32
    %c0_i32_1 = arith.constant 0 : i32
    return %c0_i32, %c0_i32_0 : i32, i32
  }
  func.func @transform_7(%arg0: i32) -> (i32, i32) {
    %c0_i32 = arith.constant 0 : i32
    %c0_i32_0 = arith.constant 0 : i32
    return %arg0, %c0_i32 : i32, i32
  }
}

</mosaic_0001>

<bundles_post_ra>
// kernel: mlp_pallas.1
= control target key start
LH: loop header
LB: loop body
LE: loop exit
PB: predicated region body
PF: predicated region fallthrough
CT: control target
= control target key end

     0   :  { %s360_s1 = inlined_call_operand.vmem [shape: f32[128,128], index: 1, kind: input, shape index: {}]   ;;  %s361_s3 = inlined_call_operand.vmem [shape: f32[128,128], index: 3, kind: input, shape index: {}]   ;;  %s362_s2 = inlined_call_operand.vmem [shape: f32[1,128], index: 2, kind: input, shape index: {}]   ;;  %s363_s0 = inlined_call_operand.vmem [shape: f32[8,128], index: 0, kind: input, shape index: {}]   ;;  %s364_s4 = inlined_call_operand.vmem [shape: f32[1,128], index: 4, kind: input, shape index: {}]   ;;  %s365_s5 = inlined_call_operand.vmem [shape: f32[128,128], index: 5, kind: input, shape index: {}]   ;;  %s366_s6 = inlined_call_operand.vmem [shape: f32[1,128], index: 6, kind: input, shape index: {}]   ;;  %s367_s7 = inlined_call_operand.vmem [shape: f32[8,128], index: 7, kind: output, shape index: {}]  }
   0x1   :  { %v42_v0 = vld [vmem:[%s360_s1 + $0x78] sm:$0xff]  ;;  %v41_v1 = vld [vmem:[%s360_s1 + $0x70] sm:$0xff]  ;;  %v40_v2 = vld [vmem:[%s360_s1 + $0x68] sm:$0xff] }
   0x2   :  { %47 = vmatpush.msra.mxu0 %v42_v0  ;;  %v39_v3 = vld [vmem:[%s360_s1 + $0x60] sm:$0xff]  ;;  %v83_v4 = vld [vmem:[%s361_s3 + $0x78] sm:$0xff]  ;;  %v82_v6 = vld [vmem:[%s361_s3 + $0x70] sm:$0xff] }
   0x3   :  { %v38_v5 = vld [vmem:[%s360_s1 + $0x58] sm:$0xff]  ;;  %88 = vmatpush.msra.mxu1 %v83_v4  ;;  %v81_v7 = vld [vmem:[%s361_s3 + $0x68] sm:$0xff]  ;;  %v37_v8 = vld [vmem:[%s360_s1 + $0x50] sm:$0xff] }
   0x4   :  { %48 = vmatpush.msra.mxu0 %v41_v1  ;;  %v80_v9 = vld [vmem:[%s361_s3 + $0x60] sm:$0xff]  ;;  %v36_v10 = vld [vmem:[%s360_s1 + $0x48] sm:$0xff]  ;;  %v79_v11 = vld [vmem:[%s361_s3 + $0x58] sm:$0xff] }
   0x5   :  { %89 = vmatpush.msra.mxu1 %v82_v6  ;;  %v35_v12 = vld [vmem:[%s360_s1 + $0x40] sm:$0xff]  ;;  %v78_v13 = vld [vmem:[%s361_s3 + $0x50] sm:$0xff]  ;;  %v34_v14 = vld [vmem:[%s360_s1 + $0x38] sm:$0xff] }
   0x6   :  { %49 = vmatpush.msra.mxu0 %v40_v2  ;;  %v77_v15 = vld [vmem:[%s361_s3 + $0x48] sm:$0xff]  ;;  %v33_v16 = vld [vmem:[%s360_s1 + $0x30] sm:$0xff]  ;;  %v76_v17 = vld [vmem:[%s361_s3 + $0x40] sm:$0xff] }
   0x7   :  { %90 = vmatpush.msra.mxu1 %v81_v7  ;;  %v32_v18 = vld [vmem:[%s360_s1 + $0x28] sm:$0xff]  ;;  %v75_v19 = vld [vmem:[%s361_s3 + $0x38] sm:$0xff]  ;;  %v31_v20 = vld [vmem:[%s360_s1 + $0x20] sm:$0xff] }
   0x8   :  { %50 = vmatpush.msra.mxu0 %v39_v3  ;;  %v74_v21 = vld [vmem:[%s361_s3 + $0x30] sm:$0xff]  ;;  %v30_v22 = vld [vmem:[%s360_s1 + $0x18] sm:$0xff]  ;;  %v73_v23 = vld [vmem:[%s361_s3 + $0x28] sm:$0xff] }
   0x9   :  { %91 = vmatpush.msra.mxu1 %v80_v9  ;;  %v29_v24 = vld [vmem:[%s360_s1 + $0x10] sm:$0xff]  ;;  %v28_v25 = vld [vmem:[%s360_s1 + $0x8] sm:$0xff]  ;;  %v27_v26 = vld [vmem:[%s360_s1] sm:$0xff] }
   0xa   :  { %51 = vmatpush.msra.mxu0 %v38_v5  ;;  %v26_v27 = vld [vmem:[%s363_s0] sm:$0xff]  ;;  %v71_v29 = vld [vmem:[%s361_s3 + $0x18] sm:$0xff]  ;;  %v70_v30 = vld [vmem:[%s361_s3 + $0x10] sm:$0xff] }
   0xb   :  { %92 = vmatpush.msra.mxu1 %v79_v11  ;;  %v72_v28 = vld [vmem:[%s361_s3 + $0x20] sm:$0xff]  ;;  %v69_v31 = vld [vmem:[%s361_s3 + $0x8] sm:$0xff]  ;;  %v124_v33 = vld [vmem:[%s365_s5 + $0x78] sm:$0xff] }
   0xc   :  { %52 = vmatpush.msra.mxu0 %v37_v8  ;;  %v68_v32 = vld [vmem:[%s361_s3] sm:$0xff]  ;;  %v123_v34 = vld [vmem:[%s365_s5 + $0x70] sm:$0xff]  ;;  %129 = vmatpush.msra.mxu2 %v124_v33  ;;  %v122_v35 = vld [vmem:[%s365_s5 + $0x68] sm:$0xff] }
   0xd   :  { %93 = vmatpush.msra.mxu1 %v78_v13  ;;  %v121_v36 = vld [vmem:[%s365_s5 + $0x60] sm:$0xff]  ;;  %v120_v37 = vld [vmem:[%s365_s5 + $0x58] sm:$0xff]  ;;  %v119_v38 = vld [vmem:[%s365_s5 + $0x50] sm:$0xff] }
   0xe   :  { %53 = vmatpush.msra.mxu0 %v36_v10  ;;  %130 = vmatpush.msra.mxu2 %v123_v34  ;;  %v118_v39 = vld [vmem:[%s365_s5 + $0x48] sm:$0xff]  ;;  %v117_v40 = vld [vmem:[%s365_s5 + $0x40] sm:$0xff]  ;;  %v116_v41 = vld [vmem:[%s365_s5 + $0x38] sm:$0xff] }
   0xf   :  { %94 = vmatpush.msra.mxu1 %v77_v15  ;;  %v115_v42 = vld [vmem:[%s365_s5 + $0x30] sm:$0xff]  ;;  %v114_v43 = vld [vmem:[%s365_s5 + $0x28] sm:$0xff]  ;;  %v154_v44 = vld [vmem:[%s362_s2] ss:$0 sm:$0xff] }
  0x10   :  { %54 = vmatpush.msra.mxu0 %v35_v12  ;;  %131 = vmatpush.msra.mxu2 %v122_v35  ;;  %v113_v48 = vld [vmem:[%s365_s5 + $0x20] sm:$0xff]  ;;  %v112_v49 = vld [vmem:[%s365_s5 + $0x18] sm:$0xff]  ;;  %v111_v50 = vld [vmem:[%s365_s5 + $0x10] sm:$0xff] }
  0x11   :  { %95 = vmatpush.msra.mxu1 %v76_v17  ;;  %v110_v51 = vld [vmem:[%s365_s5 + $0x8] sm:$0xff]  ;;  %v109_v52 = vld [vmem:[%s365_s5] sm:$0xff] }
  0x12   :  { %55 = vmatpush.msra.mxu0 %v34_v14  ;;  %132 = vmatpush.msra.mxu2 %v121_v36  ;;  %v155_v53 = vld [vmem:[%s364_s4] ss:$0 sm:$0xff] }
  0x13   :  { %96 = vmatpush.msra.mxu1 %v75_v19  ;;  %v156_v57 = vld [vmem:[%s366_s6] ss:$0 sm:$0xff] }
  0x14   :  { %56 = vmatpush.msra.mxu0 %v33_v16  ;;  %133 = vmatpush.msra.mxu2 %v120_v37 }
  0x15   :  { %97 = vmatpush.msra.mxu1 %v74_v21 }
  0x16   :  { %57 = vmatpush.msra.mxu0 %v32_v18  ;;  %134 = vmatpush.msra.mxu2 %v119_v38 }
  0x17   :  { %98 = vmatpush.msra.mxu1 %v73_v23 }
  0x18   :  { %58 = vmatpush.msra.mxu0 %v31_v20  ;;  %135 = vmatpush.msra.mxu2 %v118_v39 }
  0x19   :  { %99 = vmatpush.msra.mxu1 %v72_v28 }
  0x1a   :  { %59 = vmatpush.msra.mxu0 %v30_v22  ;;  %136 = vmatpush.msra.mxu2 %v117_v40 }
  0x1b   :  { %100 = vmatpush.msra.mxu1 %v71_v29 }
  0x1c   :  { %60 = vmatpush.msra.mxu0 %v29_v24  ;;  %137 = vmatpush.msra.mxu2 %v116_v41 }
  0x1d   :  { %101 = vmatpush.msra.mxu1 %v70_v30 }
  0x1e   :  { %61 = vmatpush.msra.mxu0 %v28_v25  ;;  %138 = vmatpush.msra.mxu2 %v115_v42 }
  0x1f   :  { %102 = vmatpush.msra.mxu1 %v69_v31 }
  0x20   :  { %62 = vmatpush.msra.mxu0 %v27_v26  ;;  %139 = vmatpush.msra.mxu2 %v114_v43 }
  0x21   :  { %63 = vmatmul.f32.vlgmr.msra.gmra.mxu0 %v26_v27  ;;  %103 = vmatpush.msra.mxu1 %v68_v32 }
  0x22   :  { %140 = vmatpush.msra.mxu2 %v113_v48 }
  0x24   :  { %141 = vmatpush.msra.mxu2 %v112_v49 }
  0x26   :  { %142 = vmatpush.msra.mxu2 %v111_v50 }
  0x28   :  { %143 = vmatpush.msra.mxu2 %v110_v51 }
  0x2a   :  { %144 = vmatpush.msra.mxu2 %v109_v52 }
  0x9e   :  { %v64_v45 = vpop.f32.mrf.mxu0 }
  0x9f   :  { %v65_v46 = vadd.f32 %v154_v44, %v64_v45 }
  0xa1   :  { %157 = vtanh.f32 %v65_v46 }
  0xa7   :  { %v158_v47 = vpop.eup %157 }
  0xa8   :  { %104 = vmatmul.f32.vlgmr.msra.gmra.mxu1 %v158_v47 }
 0x125   :  { %v105_v54 = vpop.f32.mrf.mxu1 }
 0x126   :  { %v106_v55 = vadd.f32 %v155_v53, %v105_v54 }
 0x128   :  { %159 = vtanh.f32 %v106_v55 }
 0x12e   :  { %v160_v56 = vpop.eup %159 }
 0x12f   :  { %145 = vmatmul.f32.vlgmr.msra.gmra.mxu2 %v160_v56 }
 0x1b2   :  { %v146_v58 = vpop.f32.mrf.mxu2 }
 0x1b3   :  { %v147_v59 = vadd.f32 %v156_v57, %v146_v58 }
 0x1b5   :  { %149 = vst [vmem:[%s367_s7] sm:$0xff] %v147_v59 }

</bundles_post_ra>
